<compile_context>
chip_gen: v7x
topology: tpu7x:2x2x1
jax: 0.10.0
libtpu: 0.0.40
codegen_flags: <defaults>
</compile_context>

<pallas_src>
import math

import jax
import jax.numpy as jnp
from jax.experimental import pallas as pl
from jax.experimental.pallas import tpu as pltpu


def _round_up(n, m):
    return ((n + m - 1) // m) * m


def _pe_kernel(po_ref, tab_ref, out_ref):
    # po_ref : (rb, C)  f32 -- row m = [p_0,o_0,1, ..., p_{k-1},o_{k-1},1, 0pad]
    # tab_ref: (C, L)   f32 -- block-diag: rows 3i..3i+2 x cols i*D..(i+1)*D
    #                          hold [dt_pitch; dt_oct; phase]
    # out_ref: (rb, L)       -- L = k * d_model (lane-dense for d_model < 128)
    arg = jnp.dot(
        po_ref[...],
        tab_ref[...],
        preferred_element_type=jnp.float32,
        precision=jax.lax.Precision.HIGHEST,   # exact f32 arg via MXU passes
    )
    out_ref[...] = jnp.sin(arg).astype(out_ref.dtype)


def pitch_positional_encoding(x, octave, d_model, *, row_block=1024,
                              out_dtype=jnp.float32,
                              vmem_budget_bytes=24 * 1024 * 1024):
    if d_model % 2 != 0:
        raise ValueError("d_model must be even")
    # torch's interleaved cos assignment only lines up when d_model % 4 == 0.
    assert d_model % 4 == 0, "d_model must be a multiple of 4"

    B, T, _ = x.shape
    H = d_model // 2
    N = B * T

    # ---- lane packing factor ------------------------------------------------
    k = max(1, 128 // d_model)          # logical rows per physical row
    L = k * d_model                     # physical row width (128 when D | 128)
    M = -(-N // k)                      # physical rows
    N_used = M * k

    # ---- per-output-column tables (exact torch div_term, f32) ---------------
    div_term = jnp.exp(
        jnp.arange(0, H, 2, dtype=jnp.float32) * (-math.log(10000.0) / H)
    )                                                       # (H // 2,)
    j = jnp.arange(d_model)
    dt_full = div_term[(j % H) // 2].astype(jnp.float32)    # (D,)
    phase = (j % 2).astype(jnp.float32) * (math.pi / 2.0)   # cos x = sin(x+pi/2)
    pitch_half = j < H
    dt_pitch = jnp.where(pitch_half, dt_full, 0.0)
    dt_oct = jnp.where(pitch_half, 0.0, dt_full)
    tab3 = jnp.stack([dt_pitch, dt_oct, phase], axis=0)     # (3, D)

    C = 3 * k
    C_pad = _round_up(C, 8)
    tab = jnp.kron(jnp.eye(k, dtype=jnp.float32), tab3)     # (3k, L) block-diag
    if C_pad != C:
        tab = jnp.pad(tab, ((0, C_pad - C), (0, 0)))         # (C_pad, L)

    # ---- packed per-row scalars [pitch, octave, 1] per logical row ----------
    pitch = x[:, :, 0].reshape(N).astype(jnp.float32)
    octv = octave.reshape(N).astype(jnp.float32)
    if N_used != N:                      # pad the tiny scalar inputs only
        pitch = jnp.pad(pitch, (0, N_used - N))
        octv = jnp.pad(octv, (0, N_used - N))
    po = jnp.stack([pitch, octv, jnp.ones_like(pitch)], axis=-1)  # (N_used, 3)
    po = po.reshape(M, C)
    if C_pad != C:
        po = jnp.pad(po, ((0, 0), (0, C_pad - C)))           # (M, C_pad)

    # ---- tile sizing: big rows, dtype-aware sublane alignment, VMEM-safe ----
    itemsize = jnp.dtype(out_dtype).itemsize
    sub = 8 * max(1, 4 // itemsize)      # 8 (f32) / 16 (bf16) / 32 (8-bit)
    lanes = lambda n: _round_up(n, 128)

    def vmem_bytes(rb):
        out_buf = rb * lanes(L) * itemsize
        po_buf = rb * lanes(C_pad) * 4
        tab_buf = _round_up(C_pad, 8) * lanes(L) * 4        # fetched once
        return 2 * (out_buf + po_buf) + tab_buf

    rb = max(sub, (row_block // sub) * sub)
    # v7x: keep >= 2 grid steps when there is enough work so both TCs get some.
    rb = min(rb, max(sub, _round_up(-(-M // 2), sub)))
    while rb > sub and vmem_bytes(rb) > vmem_budget_bytes:
        rb = max(sub, ((rb // 2) // sub) * sub)

    grid = (pl.cdiv(M, rb),)             # ragged last block masked by Pallas

    pe_packed = pl.pallas_call(
        _pe_kernel,
        out_shape=jax.ShapeDtypeStruct((M, L), out_dtype),
        grid=grid,
        in_specs=[
            pl.BlockSpec((rb, C_pad), lambda i: (i, 0)),
            pl.BlockSpec((C_pad, L), lambda i: (0, 0)),
        ],
        out_specs=pl.BlockSpec((rb, L), lambda i: (i, 0)),
        compiler_params=pltpu.CompilerParams(
            dimension_semantics=("parallel",),
            vmem_limit_bytes=32 * 1024 * 1024,
        ),
    )(po, tab)

    pe = pe_packed.reshape(N_used, d_model)   # row-major split, no data movement
    if N_used != N:
        # TODO(synk): only hit when (B*T) % k != 0; costs one output copy.
        pe = pe[:N]
    return pe.reshape(B, T, d_model)


def _reference_pe(x, octave, d_model):
    """Pure-JAX replica of the torch forward (strided slice assignments)."""
    B, T, _ = x.shape
    H = d_model // 2
    div_term = jnp.exp(
        jnp.arange(0, H, 2, dtype=jnp.float32) * (-math.log(10000.0) / H)
    )
    pitch = x[:, :, :1].astype(jnp.float32)
    octv = octave[..., None].astype(jnp.float32)
    pe = jnp.zeros((B, T, d_model), jnp.float32)
    pe = pe.at[:, :, 0:H:2].set(jnp.sin(pitch * div_term))
    pe = pe.at[:, :, 1:H:2].set(jnp.cos(pitch * div_term))
    pe = pe.at[:, :, H::2].set(jnp.sin(octv * div_term))
    pe = pe.at[:, :, H + 1::2].set(jnp.cos(octv * div_term))
    return pe


if __name__ == "__main__":
    B, T, F, D_MODEL = 2, 8, 4, 32

    key = jax.random.PRNGKey(0)
    kx, ko = jax.random.split(key)
    # pitch-class-like values in x[..., 0]; extra feature columns unused (as in torch)
    x = jax.random.uniform(kx, (B, T, F), dtype=jnp.float32, minval=0.0, maxval=12.0)
    octave = jax.random.randint(ko, (B, T), 0, 9).astype(jnp.float32)

    pe = pitch_positional_encoding(x, octave, D_MODEL)
    pe = jax.block_until_ready(pe)

    ref = _reference_pe(x, octave, D_MODEL)
    assert pe.shape == (B, T, D_MODEL)
    assert jnp.allclose(pe, ref, atol=1e-5, rtol=1e-5), "mismatch vs reference"

    print("KERNEL_OK")
</pallas_src>

<mosaic_0001>
module attributes {stable_mosaic.version = 11 : i64} {
  func.func @_pe_kernel(%arg0: i32, %arg1: memref<8x16xf32, #tpu.memory_space<vmem>>, %arg2: memref<16x128xf32, #tpu.memory_space<vmem>>, %arg3: memref<8x128xf32, #tpu.memory_space<vmem>>) attributes {dimension_semantics = [#tpu.dimension_semantics<parallel>], iteration_bounds = array<i64: 1>, scalar_prefetch = 0 : i64, scratch_operands = 0 : i64, tpu.core_type = #tpu.core_type<tc>, window_params = [{transform_indices = @transform_0, window_bounds = array<i64: 8, 16>}, {pipeline_mode = #tpu.pipeline_mode<synchronous>, transform_indices = @transform_1, window_bounds = array<i64: 16, 128>}, {transform_indices = @transform_2, window_bounds = array<i64: 8, 128>}]} {
    %c0 = arith.constant 0 : index
    %c0_0 = arith.constant 0 : index
    %0 = vector.load %arg1[%c0, %c0_0] : memref<8x16xf32, #tpu.memory_space<vmem>>, vector<8x16xf32>
    %c0_1 = arith.constant 0 : index
    %c0_2 = arith.constant 0 : index
    %1 = vector.load %arg2[%c0_1, %c0_2] : memref<16x128xf32, #tpu.memory_space<vmem>>, vector<16x128xf32>
    %cst = arith.constant dense<0.000000e+00> : vector<8x128xf32>
    %2 = tpu.matmul %0, %1, %cst {dimension_numbers = #tpu.dot_dimension_numbers<[1], [0], [0], [1], [0, 0, 1, 1], [], []>, precision = #tpu.contract_precision<fp32>} : vector<8x16xf32>, vector<16x128xf32>, vector<8x128xf32> -> vector<8x128xf32>
    %3 = math.sin %2 : vector<8x128xf32>
    %c0_3 = arith.constant 0 : index
    %c0_4 = arith.constant 0 : index
    %4 = vector.load %arg3[%c0_3, %c0_4] : memref<8x128xf32, #tpu.memory_space<vmem>>, vector<8x128xf32>
    tpu.vector_store %arg3[%c0_3, %c0_4], %3 {strides = array<i32>} : memref<8x128xf32, #tpu.memory_space<vmem>>, vector<8x128xf32>,
    return
  }
  func.func @transform_0(%arg0: i32) -> (i32, i32) {
    %c0_i32 = arith.constant 0 : i32
    %c0_i32_0 = arith.constant 0 : i32
    return %arg0, %c0_i32 : i32, i32
  }
  func.func @transform_1(%arg0: i32) -> (i32, i32) {
    %c0_i32 = arith.constant 0 : i32
    %c0_i32_0 = arith.constant 0 : i32
    %c0_i32_1 = arith.constant 0 : i32
    return %c0_i32, %c0_i32_0 : i32, i32
  }
  func.func @transform_2(%arg0: i32) -> (i32, i32) {
    %c0_i32 = arith.constant 0 : i32
    %c0_i32_0 = arith.constant 0 : i32
    return %arg0, %c0_i32 : i32, i32
  }
}

</mosaic_0001>

<bundles_post_ra>
// kernel: tpu_custom_call.1
= control target key start
LH: loop header
LB: loop body
LE: loop exit
PB: predicated region body
PF: predicated region fallthrough
CT: control target
= control target key end

     0   :  { %7 = vsyncpa [#allocation3], 0  ;;  %s916_s0 = inlined_call_operand.hbm [shape: f32[4,16], index: 0, kind: input, shape index: {}]   ;;  %s917_s1 = inlined_call_operand.hbm [shape: f32[16,128], index: 1, kind: input, shape index: {}]   ;;  %s918_s2 = inlined_call_operand.hbm [shape: f32[4,128], index: 2, kind: output, shape index: {}]  }
   0x1   :  { %8 = vsyncpa [#allocation6], 0 }
   0x2   :  { %9 = vsyncpa [#allocation4], 0 }
   0x3   :  { %14 = vsyncadd [#allocation3], 64  ;;  %s816_s9 = smov [#allocation2]   ;;  %s744_s13 = scalar_lea.hbm %s916_s0, 64 }
   0x4   :  { %s15_s10 = sshll.u32 %s816_s9, 4  ;;  %p745_p0 = scmp.ne.s32.totalorder %s916_s0, %s744_s13  ;;  %s16_s10 = int_to_ptr.vmem [resolvable:$true] %s15_s10 }
   0x5   :  { %p748_p1 = scmp.lt.u32.totalorder %s744_s13, %s916_s0 }
   0x7   :  { %p750_p2 = pnand %p748_p1, %p745_p0 }
   0x9   :  { %753 = shalt.err (!%p750_p2)
}
   0xa   :  { %s754_s18 = scalar_lea.vmem %s16_s10, 64  ;;  %s758_s19 = scalar_lea.vmem %s16_s10, 128 }
   0xb   :  { %p755_p3 = scmp.ne.s32.totalorder %s16_s10, %s754_s18  ;;  %p759_p4 = scmp.lt.s32.totalorder %s16_s10, %s16_s10 }
   0xc   :  { %p760_p5 = scmp.lt.s32.totalorder %s758_s19, %s754_s18 }
   0xe   :  { %p761_p6 = por %p760_p5, %p759_p4 }
  0x10   :  { %p762_p7 = pnand %p761_p6, %p755_p3 }
  0x12   :  { %765 = shalt.err (!%p762_p7)
}
  0x13   :  { %s817_s20 = smov 64   ;;  %s818_s21 = smov 4  }
  0x14   :  { %21 = dma.hbm_to_vmem [thread:$0]  %s916_s0, 64, %s16_s10, [#allocation3], %s817_s20, %s817_s20, %s818_s21  }
  0x15   :  { %s819_s24 = smov [#allocation5]   ;;  %s766_s28 = scalar_lea.hbm %s917_s1, 256 }
  0x16   :  { %s27_s25 = sshll.u32 %s819_s24, 4  ;;  %p767_p8 = scmp.ne.s32.totalorder %s917_s1, %s766_s28  ;;  %s28_s25 = int_to_ptr.vmem [resolvable:$true] %s27_s25 }
  0x17   :  { %p770_p9 = scmp.lt.u32.totalorder %s766_s28, %s917_s1 }
  0x19   :  { %p772_p10 = pnand %p770_p9, %p767_p8 }
  0x1b   :  { %775 = shalt.err (!%p772_p10)
}
  0x1c   :  { %s776_s5 = scalar_lea.vmem %s28_s25, 256  ;;  %p781_p12 = scmp.lt.s32.totalorder %s28_s25, %s28_s25 }
  0x1d   :  { %p777_p11 = scmp.ne.s32.totalorder %s28_s25, %s776_s5  ;;  %p782_p13 = scmp.lt.s32.totalorder %s776_s5, %s776_s5 }
  0x1f   :  { %p783_p0 = por %p782_p13, %p781_p12 }
  0x21   :  { %p784_p1 = pnand %p783_p0, %p777_p11 }
  0x23   :  { %787 = shalt.err (!%p784_p1)
}
  0x24   :  { %s820_s0 = smov 128   ;;  %s821_s6 = smov 8  }
  0x25   :  { %33 = dma.hbm_to_vmem [thread:$0]  %s917_s1, 256, %s28_s25, [#allocation6], %s820_s0, %s820_s0, %s821_s6  }
  0x26   :  { %810 = dma.done.wait [#allocation3], 128  }
  0x27   :  { %811 = vsyncadd [#allocation3], 4294967168 }
  0x28   :  { %812 = dma.done.wait [#allocation6], 256  }
  0x29   :  { %813 = vsyncadd [#allocation6], 4294967040  ;;  %v822_v0 = vmov 0.0|0.0   ;;  %vm823_vm0 = vmmov 0   ;;  %v824_v1 = vmov 0.0   ;;  %vm43_vm1 = vcmask 130048  }
  0x2a   :  { %702 = vmatprep.subr.bf16.mxu0 %v822_v0  ;;  %676 = vmatprep.mubr.msk.f32.mxu0 %vm823_vm0, %v824_v1  ;;  %v41_v2 = vld [vmem:[#allocation5] sm:$0xff]  ;;  %v42_v3 = vld [vmem:[#allocation5 + $0x8] sm:$0xff]  ;;  %v40_v4 = vld [vmem:[#allocation2] sm:$0xff]  ;;  %v825_v40 = vmov 683565275  }
  0x2b   :  { %693 = vmatprep.subr.bf16.mxu1 %v822_v0  ;;  %655 = vmatprep.mubr.msk.f32.mxu1 %vm823_vm0, %v824_v1  ;;  %v48_v5 = vand.u32 4294901760, %v41_v2  ;;  %v51_v6 = vand.u32 4294901760, %v42_v3  ;;  %v45_v7 = vsel %vm43_vm1, %v40_v4, 0  ;;  %v826_v42 = vmov 2475754826  }
  0x2c   :  { %v114_v8 = vand.u32 4294901760, %v45_v7  ;;  %v827_v45 = vmov 2131351028   ;;  %v828_v48 = vmov 2102212464  }
  0x2d   :  { %v694_v9 = vpack.c.bf16 %v51_v6, %v48_v5  ;;  %v126_v10 = vsub.f32 %v41_v2, %v48_v5  ;;  %v133_v11 = vsub.f32 %v42_v3, %v51_v6  ;;  %v829_v51 = vmov 920167782  }
  0x2e   :  { %v115_v12 = vsub.f32 %v45_v7, %v114_v8  ;;  %v830_v54 = vmov 1326507024  }
  0x2f   :  { %704 = vmatpush3.bf16.msra.mxu0 %v694_v9  ;;  %695 = vmatpush3.bf16.msra.mxu1 %v694_v9  ;;  %v127_v13 = vand.u32 4294901760, %v126_v10  ;;  %v134_v14 = vand.u32 4294901760, %v133_v11  ;;  %v700_v24 = vpack.c.bf16 %v133_v11, %v126_v10 }
  0x30   :  { %v116_v15 = vand.u32 4294901760, %v115_v12  ;;  %696 = vmatprep.subr.bf16.mxu1 %v822_v0  ;;  %705 = vmatprep.subr.bf16.mxu0 %v822_v0 }
  0x31   :  { %v128_v16 = vsub.f32 %v126_v10, %v127_v13  ;;  %v135_v17 = vsub.f32 %v133_v11, %v134_v14  ;;  %v706_v18 = vpack.c.bf16 %v134_v14, %v127_v13 }
  0x32   :  { %677 = vmatmul.mubr.f32.vlgmr.msra.gmra.mrb[0].mxu0 %v116_v15  ;;  %v117_v19 = vsub.f32 %v115_v12, %v116_v15 }
  0x33   :  { %v129_v20 = vand.u32 4294901760, %v128_v16  ;;  %v136_v21 = vand.u32 4294901760, %v135_v17  ;;  %707 = vmatpush3.bf16.msra.mxu0 %v706_v18  ;;  %683 = vmatprep.mubr.msk.f32.mxu0 %vm823_vm0, %v824_v1 }
  0x34   :  { %v118_v22 = vand.u32 4294901760, %v117_v19  ;;  %708 = vmatprep.subr.bf16.mxu0 %v822_v0 }
  0x35   :  { %v697_v23 = vpack.c.bf16 %v136_v21, %v129_v20 }
  0x36   :  { %656 = vmatmul.mubr.f32.vlgmr.msra.gmra.mrb[0].mxu1 %v118_v22 }
  0x37   :  { %698 = vmatpush3.bf16.msra.mxu1 %v697_v23  ;;  %662 = vmatprep.mubr.msk.f32.mxu1 %vm823_vm0, %v824_v1 }
  0x38   :  { %699 = vmatprep.subr.bf16.mxu1 %v822_v0 }
  0x3a   :  { %684 = vmatmul.mubr.f32.vlgmr.msra.gmra.mrb[0].mxu0 %v114_v8 }
  0x3b   :  { %710 = vmatpush3.bf16.msra.mxu0 %v694_v9  ;;  %690 = vmatprep.mubr.msk.f32.mxu0 %vm823_vm0, %v824_v1 }
  0x3e   :  { %663 = vmatmul.mubr.f32.vlgmr.msra.gmra.mrb[0].mxu1 %v114_v8 }
  0x3f   :  { %701 = vmatpush3.bf16.msra.mxu1 %v700_v24  ;;  %669 = vmatprep.mubr.msk.f32.mxu1 %vm823_vm0, %v824_v1 }
  0x42   :  { %691 = vmatmul.mubr.f32.vlgmr.msra.gmra.mrb[0].mxu0 %v114_v8 }
  0x46   :  { %670 = vmatmul.mubr.f32.vlgmr.msra.gmra.mrb[0].mxu1 %v115_v12 }
 0x115   :  { %v502_v25 = vpop.f32.mrb[0].mxu0 }
 0x116   :  { %v692_v26 = vpop.f32.mrb[1].mxu0 }
 0x119   :  { %v277_v27 = vpop.f32.mrb[0].mxu1 }
 0x11a   :  { %v880_v28 = vadd.f32 %v502_v25, %v277_v27  ;;  %v671_v29 = vpop.f32.mrb[1].mxu1 }
 0x11c   :  { %v509_v30 = vand.u32 2139095040, %v880_v28  ;;  %v506_v34 = vand.u32 2147483647, %v880_v28  ;;  %vm508_vm9 = vcmp.lt.s32.totalorder %v880_v28, 0  ;;  %vm598_vm14 = vweird.f32 %v880_v28 }
 0x11e   :  { %v510_v31 = vshrl.u32 %v509_v30, 23  ;;  %v513_v37 = vand.u32 8388607, %v506_v34  ;;  %vm507_vm10 = vcmp.le.f32.partialorder %v506_v34, 0.7853982 }
 0x120   :  { %v629_v32 = vadd.s32 4294967169, %v510_v31  ;;  %v514_v56 = vor.u32 8388608, %v513_v37 }
 0x122   :  { %v516_v33 = vadd.s32 1, %v629_v32  ;;  %v554_v6 = vshll.u32 %v514_v56, 8 }
 0x124   :  { %vm517_vm2 = vcmp.gt.s32.totalorder %v516_v33, 0 }
 0x125   :  { %v518_v35 = vsel %vm517_vm2, %v516_v33, 0 }
 0x126   :  { %v520_v36 = vand.u32 31, %v518_v35  ;;  %v519_v39 = vshrl.u32 %v518_v35, 5 }
 0x128   :  { %v521_v38 = vsub.s32 32, %v520_v36  ;;  %v523_v41 = vshll.u32 %v825_v40, %v520_v36  ;;  %v526_v43 = vshll.u32 %v826_v42, %v520_v36  ;;  %v529_v47 = vshll.u32 %v827_v45, %v520_v36 }
 0x129   :  { %v532_v50 = vshll.u32 %v828_v48, %v520_v36  ;;  %v535_v53 = vshll.u32 %v829_v51, %v520_v36  ;;  %vm538_vm3 = vcmp.lt.s32.totalorder %v519_v39, 1  ;;  %vm541_vm4 = vcmp.lt.s32.totalorder %v519_v39, 4 }
 0x12a   :  { %v524_v44 = vshrl.u32 %v826_v42, %v521_v38  ;;  %v527_v46 = vshrl.u32 %v827_v45, %v521_v38  ;;  %v530_v49 = vshrl.u32 %v828_v48, %v521_v38  ;;  %v533_v52 = vshrl.u32 %v829_v51, %v521_v38 }
 0x12b   :  { %v536_v55 = vshrl.u32 %v830_v54, %v521_v38  ;;  %v522_v1 = vshrl.u32 %v825_v40, %v521_v38  ;;  %vm540_vm5 = vcmp.lt.s32.totalorder %v519_v39, 3  ;;  %vm539_vm6 = vcmp.lt.s32.totalorder %v519_v39, 2 }
 0x12c   :  { %v525_v57 = vor.u32 %v524_v44, %v523_v41  ;;  %v528_v58 = vor.u32 %v527_v46, %v526_v43  ;;  %v531_v59 = vor.u32 %v530_v49, %v529_v47  ;;  %v534_v60 = vor.u32 %v533_v52, %v532_v50 }
 0x12d   :  { %v537_v61 = vor.u32 %v536_v55, %v535_v53 }
 0x12e   :  { %v543_v62 = vsel %vm541_vm4, %v531_v59, 2102212464  ;;  %v546_v63 = vsel %vm538_vm3, %v525_v57, %v528_v58  ;;  %v550_v0 = vsel %vm538_vm3, %v528_v58, %v531_v59  ;;  %v547_v2 = vsel %vm541_vm4, %v534_v60, 920167782 }
 0x12f   :  { %v551_v3 = vsel %vm541_vm4, %v537_v61, 1326507024  ;;  %v548_v4 = vsel %vm540_vm5, %v531_v59, %v547_v2  ;;  %v542_v7 = vsel %vm538_vm3, %v522_v1, %v525_v57  ;;  %v544_v8 = vsel %vm540_vm5, %v528_v58, %v543_v62 }
 0x130   :  { %v552_v5 = vsel %vm540_vm5, %v534_v60, %v551_v3  ;;  %v549_v9 = vsel %vm539_vm6, %v546_v63, %v548_v4  ;;  %v545_v15 = vsel %vm539_vm6, %v542_v7, %v544_v8 }
 0x131   :  { %v553_v10 = vsel %vm539_vm6, %v550_v0, %v552_v5  ;;  %v889_v13 = vmul.u32.u64.low %v554_v6, %v549_v9  ;;  %v890_v14 = vmul.u32.u64.high %v554_v6, %v549_v9, %v889_v13  ;;  %v561_v17 = vmul.u32 %v554_v6, %v545_v15 }
 0x132   :  { %v886_v11 = vmul.u32.u64.low %v554_v6, %v553_v10  ;;  %v887_v12 = vmul.u32.u64.high %v554_v6, %v553_v10, %v886_v11 }
 0x133   :  { %v564_v16 = vadd.s32 1, %v890_v14 }
 0x134   :  { %vm563_vm7 = vc.u32 %v887_v12, %v889_v13  ;;  %v562_v30 = vadd.s32 %v889_v13, %v887_v12 }
 0x135   :  { %v565_v18 = vsel %vm563_vm7, %v564_v16, %v890_v14 }
 0x136   :  { %v566_v19 = vadd.s32 %v565_v18, %v561_v17 }
 0x138   :  { %v567_v20 = vadd.s32 536870912, %v566_v19 }
 0x13a   :  { %v568_v21 = vshrl.u32 %v567_v20, 30 }
 0x13c   :  { %v569_v22 = vshll.u32 %v568_v21, 30  ;;  %v592_v43 = vsub.s32 4, %v568_v21 }
 0x13e   :  { %v570_v23 = vsub.s32 %v566_v19, %v569_v22  ;;  %v593_v46 = vsel %vm508_vm9, %v592_v43, %v568_v21 }
 0x13f   :  { %v595_v48 = vsel %vm507_vm10, 0, %v593_v46 }
 0x140   :  { %v572_v24 = vsub.s32 0, %v570_v23  ;;  %v599_v49 = vadd.s32 3, %v595_v48 }
 0x142   :  { %v630_v25 = vmin.u32 %v572_v24, %v570_v23  ;;  %v600_v50 = vand.u32 3, %v599_v49 }
 0x144   :  { %v574_v26 = vclz %v630_v25  ;;  %vm605_vm11 = vcmp.eq.s32.totalorder %v600_v50, 2  ;;  %vm602_vm12 = vcmp.eq.s32.totalorder %v600_v50, 0  ;;  %vm601_vm13 = vcmp.lt.s32.totalorder %v600_v50, 2 }
 0x146   :  { %v631_v27 = vadd.s32 4294967294, %v574_v26 }
 0x148   :  { %vm632_vm8 = vcmp.lt.s32.totalorder %v631_v27, 0 }
 0x149   :  { %v577_v29 = vsel %vm632_vm8, 0, %v631_v27 }
 0x14a   :  { %v578_v31 = vsub.s32 32, %v577_v29  ;;  %v582_v32 = vsub.s32 4294967266, %v577_v29  ;;  %v579_v33 = vshll.u32 %v570_v23, %v577_v29 }
 0x14c   :  { %v580_v35 = vshrl.u32 %v562_v30, %v578_v31  ;;  %v583_v36 = vadd.s32 127, %v582_v32 }
 0x14e   :  { %v581_v37 = vor.u32 %v580_v35, %v579_v33  ;;  %v584_v38 = vshll.u32 %v583_v36, 23 }
 0x150   :  { %v585_v39 = vor.u32 4788187, %v584_v38  ;;  %v588_v41 = vcvt.s32.f32 %v581_v37 }
 0x152   :  { %v586_v40 = vand.u32 2147483647, %v585_v39 }
 0x154   :  { %v589_v42 = vmul.f32 %v588_v41, %v586_v40 }
 0x156   :  { %v590_v44 = vxor.u32 2147483648, %v589_v42 }
 0x158   :  { %v591_v45 = vsel %vm508_vm9, %v590_v44, %v589_v42 }
 0x159   :  { %v594_v47 = vsel %vm507_vm10, %v880_v28, %v591_v45 }
 0x15a   :  { %740 = vcosq.f32 %v594_v47 }
 0x15b   :  { %742 = vsinq.f32 %v594_v47 }
 0x164   :  { %v741_v51 = vpop.eup %740 }
 0x165   :  { %v743_v52 = vpop.eup %742  ;;  %v606_v53 = vxor.u32 2147483648, %v741_v51 }
 0x166   :  { %v603_v54 = vxor.u32 2147483648, %v743_v52 }
 0x167   :  { %v607_v55 = vsel %vm605_vm11, %v606_v53, %v743_v52 }
 0x168   :  { %v604_v56 = vsel %vm602_vm12, %v741_v51, %v603_v54 }
 0x169   :  { %v608_v34 = vsel %vm601_vm13, %v604_v56, %v607_v55 }
 0x16a   :  { %v609_v57 = vsel %vm598_vm14, nan, %v608_v34 }
 0x16b   :  { %610 = vst [vmem:[#allocation7] sm:$0xff] %v609_v57 }
 0x16c   :  { %615 = vsyncadd [#allocation4], 64  ;;  %s831_s1 = smov [#allocation7]  }
 0x16d   :  { %s616_s9 = sshll.u32 %s831_s1, 4  ;;  %s617_s9 = int_to_ptr.vmem [resolvable:$true] %s616_s9 }
 0x16e   :  { %s788_s10 = scalar_lea.vmem %s617_s9, 64  ;;  %s792_s11 = scalar_lea.vmem %s617_s9, 128 }
 0x16f   :  { %p789_p2 = scmp.ne.s32.totalorder %s617_s9, %s788_s10  ;;  %p793_p3 = scmp.lt.s32.totalorder %s617_s9, %s617_s9 }
 0x170   :  { %p794_p4 = scmp.lt.s32.totalorder %s792_s11, %s788_s10 }
 0x172   :  { %p795_p5 = por %p794_p4, %p793_p3 }
 0x174   :  { %p796_p6 = pnand %p795_p5, %p789_p2 }
 0x176   :  { %799 = shalt.err (!%p796_p6)
}
 0x177   :  { %s800_s14 = scalar_lea.hbm %s918_s2, 64 }
 0x178   :  { %p801_p7 = scmp.ne.s32.totalorder %s918_s2, %s800_s14  ;;  %p804_p8 = scmp.lt.u32.totalorder %s800_s14, %s918_s2 }
 0x17a   :  { %p806_p9 = pnand %p804_p8, %p801_p7 }
 0x17c   :  { %809 = shalt.err (!%p806_p9)
}
 0x17d   :  { %622 = dma.vmem_to_hbm [thread:$0]  %s617_s9, 64, %s918_s2, [#allocation4], %s817_s20, %s817_s20, %s818_s21  }
 0x17e   :  { %814 = dma.done.wait [#allocation4], 128  }
 0x17f   :  { %815 = vsyncadd [#allocation4], 4294967168 }
 0x180   :  { %626 = vsyncpa [#allocation3], 1 }
 0x181   :  { %627 = vsyncpa [#allocation6], 1 }
 0x182   :  { %628 = vsyncpa [#allocation4], 1 }

</bundles_post_ra>
